<compile_context>
chip_gen: v7x
topology: tpu7x:2x2x1
jax: 0.10.0
libtpu: 0.0.40
codegen_flags: <defaults>
</compile_context>

<pallas_src>
import math

import jax
import jax.numpy as jnp
from jax.experimental import pallas as pl
from jax.experimental.pallas import tpu as pltpu


def _linear_kernel(x_ref, w_ref, b_ref, o_ref):
    # Single-shot matmul (no K grid axis): f32 accumulation inside the MXU,
    # bias add + output-dtype cast in the epilogue.
    x = x_ref[...].astype(jnp.bfloat16)  # VPU cast, hidden under the MXU.
    acc = jnp.dot(x, w_ref[...], preferred_element_type=jnp.float32)
    o_ref[...] = (acc + b_ref[...]).astype(o_ref.dtype)


def _round_up(x, m):
    return ((x + m - 1) // m) * m


def _choose_tile(dim, preferred, aligns):
    """Largest divisor of `dim` that is <= `preferred` and a multiple of one of
    `aligns` (tried in order). Falls back to the full extent."""
    for a in aligns:
        t = min(preferred, dim)
        t = (t // a) * a
        while t >= a:
            if dim % t == 0:
                return t
            t -= a
    return dim


# Double-buffered VMEM working-set budget; leaves headroom under the 48 MiB
# limit we request and under v7x's 64 MiB physical VMEM.
_VMEM_BUDGET = 40 * 1024 * 1024


def linear_pallas(x_2d, w_kn, bias, *, tm_pref=1024, tn_pref=512):
    """y = x_2d @ w_kn + bias.

    w_kn is expected pre-cast to bf16 (done once at init); bias in f32.
    The matmul runs on the MXU in bf16 with f32 accumulation; the output is
    emitted in x_2d.dtype.
    """
    M, K = x_2d.shape
    K2, N = w_kn.shape
    assert K == K2 and bias.shape == (N,)

    out_dtype = x_2d.dtype

    # Pad M to a sublane multiple rather than using an awkward full-extent
    # M block.
    M_pad = _round_up(M, 8)
    if M_pad != M:
        x_2d = jnp.pad(x_2d, ((0, M_pad - M), (0, 0)))

    # K is collapsed (tk = K). Tile N, preferring 256 alignment for the MXU.
    tn = _choose_tile(N, tn_pref, aligns=(256, 128))
    # TODO(synk): if N has no 128-multiple divisor, tn falls back to full N,
    # which could exceed the VMEM budget for very large awkward N.

    x_bytes = jnp.dtype(x_2d.dtype).itemsize
    o_bytes = jnp.dtype(out_dtype).itemsize
    # Per-buffer-pair VMEM: x (tm, K) in input dtype, W (K, tn) bf16,
    # bias (1, tn) f32, out (tm, tn) in output dtype; all double-buffered.
    fixed = 2 * (K * tn * 2 + tn * 4)
    per_row = 2 * (K * x_bytes + tn * o_bytes)
    tm_cap = max(8, (_VMEM_BUDGET - fixed) // per_row)
    tm = _choose_tile(M_pad, min(tm_pref, tm_cap), aligns=(256, 8))

    grid = (M_pad // tm, N // tn)

    bias_2d = bias.astype(jnp.float32).reshape(1, N)
    w_bf = w_kn.astype(jnp.bfloat16)  # no-op when the weight is stored bf16

    cost = pl.CostEstimate(
        flops=2 * M_pad * N * K,
        transcendentals=0,
        bytes_accessed=(
            M_pad * K * x_bytes              # x read once per row block
            + (M_pad // tm) * K * N * 2      # bf16 weight re-streamed per row block
            + M_pad * N * o_bytes            # output written once
            + N * 4                          # bias
        ),
    )

    out = pl.pallas_call(
        _linear_kernel,
        out_shape=jax.ShapeDtypeStruct((M_pad, N), out_dtype),
        grid_spec=pltpu.PrefetchScalarGridSpec(
            num_scalar_prefetch=0,
            grid=grid,
            in_specs=[
                pl.BlockSpec((tm, K), lambda i, j: (i, 0)),  # x rows (constant over j)
                pl.BlockSpec((K, tn), lambda i, j: (0, j)),  # bf16 weight stream
                pl.BlockSpec((1, tn), lambda i, j: (0, j)),  # f32 bias tile
            ],
            out_specs=pl.BlockSpec((tm, tn), lambda i, j: (i, j)),
        ),
        compiler_params=pltpu.CompilerParams(
            dimension_semantics=("parallel", "parallel"),
            vmem_limit_bytes=48 * 1024 * 1024,
        ),
        cost_estimate=cost,
    )(x_2d, w_bf, bias_2d)

    return out[:M] if M_pad != M else out


class Qwen2ConnectorPallas:
    """JAX/Pallas port of the PyTorch Qwen2Connector (a single nn.Linear)."""

    def __init__(self, input_dim=3584, output_dim=4096, key=None):
        if key is None:
            key = jax.random.PRNGKey(0)
        k_w, k_b = jax.random.split(key)
        # Mimic nn.Linear's default uniform(-1/sqrt(in), 1/sqrt(in)) init.
        bound = 1.0 / math.sqrt(input_dim)
        # PyTorch weight is (out, in); store the transpose (in, out) = (K, N),
        # cast to bf16 ONCE here so no per-call f32->bf16 weight pass is needed.
        w_f32 = jax.random.uniform(
            k_w, (input_dim, output_dim), dtype=jnp.float32,
            minval=-bound, maxval=bound,
        )
        self.w_kn = w_f32.astype(jnp.bfloat16)
        self.bias = jax.random.uniform(
            k_b, (output_dim,), dtype=jnp.float32, minval=-bound, maxval=bound
        )
        self.input_dim = input_dim
        self.output_dim = output_dim

    def __call__(self, x):
        # x: (..., input_dim) -> (..., output_dim), same dtype as x.
        lead = x.shape[:-1]
        x_2d = x.reshape(-1, self.input_dim)
        y_2d = linear_pallas(x_2d, self.w_kn, self.bias)
        return y_2d.reshape(*lead, self.output_dim)


if __name__ == "__main__":
    # Small shapes consistent with the module's forward: (batch, seq, input_dim).
    batch, seq = 2, 8
    input_dim, output_dim = 256, 512

    key = jax.random.PRNGKey(0)
    k_x, k_p = jax.random.split(key)
    x = jax.random.normal(k_x, (batch, seq, input_dim), dtype=jnp.float32)

    model = Qwen2ConnectorPallas(input_dim=input_dim, output_dim=output_dim, key=k_p)

    y = model(x)
    y = jax.block_until_ready(y)
    assert y.shape == (batch, seq, output_dim)
    assert y.dtype == x.dtype

    # Reference: same math, with x rounded to bf16 (as the kernel does) and the
    # bf16-stored weight, f32 accumulation.
    x_r = x.astype(jnp.bfloat16).astype(jnp.float32)
    w_r = model.w_kn.astype(jnp.float32)
    y_ref = (
        jnp.einsum("bsk,kn->bsn", x_r, w_r, precision=jax.lax.Precision.HIGHEST)
        + model.bias
    )
    assert jnp.allclose(y, y_ref, atol=2e-3, rtol=2e-3)

    print("KERNEL_OK")
</pallas_src>

<mosaic_0001>
module attributes {stable_mosaic.version = 11 : i64} {
  func.func @_linear_kernel(%arg0: i32, %arg1: i32, %arg2: memref<16x256xf32, #tpu.memory_space<vmem>>, %arg3: memref<256x512xbf16, #tpu.memory_space<vmem>>, %arg4: memref<1x512xf32, #tpu.memory_space<vmem>>, %arg5: memref<16x512xf32, #tpu.memory_space<vmem>>) attributes {dimension_semantics = [#tpu.dimension_semantics<parallel>, #tpu.dimension_semantics<parallel>], iteration_bounds = array<i64: 1, 1>, scalar_prefetch = 0 : i64, scratch_operands = 0 : i64, tpu.core_type = #tpu.core_type<tc>, window_params = [{transform_indices = @transform_0, window_bounds = array<i64: 16, 256>}, {transform_indices = @transform_1, window_bounds = array<i64: 256, 512>}, {transform_indices = @transform_2, window_bounds = array<i64: 1, 512>}, {transform_indices = @transform_3, window_bounds = array<i64: 16, 512>}]} {
    %c0 = arith.constant 0 : index
    %c0_0 = arith.constant 0 : index
    %0 = vector.load %arg2[%c0, %c0_0] : memref<16x256xf32, #tpu.memory_space<vmem>>, vector<16x256xf32>
    %1 = arith.truncf %0 : vector<16x256xf32> to vector<16x256xbf16>
    %c0_1 = arith.constant 0 : index
    %c0_2 = arith.constant 0 : index
    %2 = vector.load %arg3[%c0_1, %c0_2] : memref<256x512xbf16, #tpu.memory_space<vmem>>, vector<256x512xbf16>
    %cst = arith.constant dense<0.000000e+00> : vector<16x512xf32>
    %3 = tpu.matmul %1, %2, %cst {dimension_numbers = #tpu.dot_dimension_numbers<[1], [0], [0], [1], [0, 0, 1, 1], [], []>} : vector<16x256xbf16>, vector<256x512xbf16>, vector<16x512xf32> -> vector<16x512xf32>
    %c0_3 = arith.constant 0 : index
    %c0_4 = arith.constant 0 : index
    %4 = vector.load %arg4[%c0_3, %c0_4] : memref<1x512xf32, #tpu.memory_space<vmem>>, vector<1x512xf32>
    %5 = vector.broadcast %4 : vector<1x512xf32> to vector<16x512xf32>
    %6 = arith.addf %3, %5 : vector<16x512xf32>
    %c0_5 = arith.constant 0 : index
    %c0_6 = arith.constant 0 : index
    %7 = vector.load %arg5[%c0_5, %c0_6] : memref<16x512xf32, #tpu.memory_space<vmem>>, vector<16x512xf32>
    tpu.vector_store %arg5[%c0_5, %c0_6], %6 {strides = array<i32>} : memref<16x512xf32, #tpu.memory_space<vmem>>, vector<16x512xf32>,
    return
  }
  func.func @transform_0(%arg0: i32, %arg1: i32) -> (i32, i32) {
    %c0_i32 = arith.constant 0 : i32
    %c0_i32_0 = arith.constant 0 : i32
    return %arg0, %c0_i32 : i32, i32
  }
  func.func @transform_1(%arg0: i32, %arg1: i32) -> (i32, i32) {
    %c0_i32 = arith.constant 0 : i32
    %c0_i32_0 = arith.constant 0 : i32
    return %c0_i32, %arg1 : i32, i32
  }
  func.func @transform_2(%arg0: i32, %arg1: i32) -> (i32, i32) {
    %c0_i32 = arith.constant 0 : i32
    %c0_i32_0 = arith.constant 0 : i32
    return %c0_i32, %arg1 : i32, i32
  }
  func.func @transform_3(%arg0: i32, %arg1: i32) -> (i32, i32) {
    %c0_i32 = arith.constant 0 : i32
    return %arg0, %arg1 : i32, i32
  }
}

</mosaic_0001>

<bundles_post_ra>
// kernel: tpu_custom_call.1
= control target key start
LH: loop header
LB: loop body
LE: loop exit
PB: predicated region body
PF: predicated region fallthrough
CT: control target
= control target key end

     0   :  { %8 = vsyncpa [#allocation3], 0  ;;  %s872_s0 = inlined_call_operand.hbm [shape: f32[16,256], index: 0, kind: input, shape index: {}]   ;;  %s873_s1 = inlined_call_operand.hbm [shape: bf16[256,512], index: 1, kind: input, shape index: {}]   ;;  %s874_s2 = inlined_call_operand.vmem [shape: f32[1,512], index: 2, kind: input, shape index: {}]   ;;  %s875_s3 = inlined_call_operand.hbm [shape: f32[16,512], index: 3, kind: output, shape index: {}]  }
   0x1   :  { %9 = vsyncpa [#allocation6], 0 }
   0x2   :  { %10 = vsyncpa [#allocation4], 0  ;;  %s806_s12 = smov [#allocation2]   ;;  %s734_s16 = scalar_lea.hbm %s872_s0, 512 }
   0x3   :  { %s16_s13 = sshll.u32 %s806_s12, 4  ;;  %p735_p0 = scmp.ne.s32.totalorder %s872_s0, %s734_s16  ;;  %s17_s13 = int_to_ptr.vmem [resolvable:$true] %s16_s13 }
   0x4   :  { %p738_p1 = scmp.lt.u32.totalorder %s734_s16, %s872_s0 }
   0x6   :  { %p740_p2 = pnand %p738_p1, %p735_p0 }
   0x8   :  { %743 = shalt.err (!%p740_p2)
}
   0x9   :  { %s744_s21 = scalar_lea.vmem %s17_s13, 512  ;;  %p749_p4 = scmp.lt.s32.totalorder %s17_s13, %s17_s13 }
   0xa   :  { %p745_p3 = scmp.ne.s32.totalorder %s17_s13, %s744_s21  ;;  %p750_p5 = scmp.lt.s32.totalorder %s744_s21, %s744_s21 }
   0xc   :  { %p751_p6 = por %p750_p5, %p749_p4 }
   0xe   :  { %p752_p7 = pnand %p751_p6, %p745_p3 }
  0x10   :  { %755 = shalt.err (!%p752_p7)
}
  0x11   :  { %s807_s22 = smov 256   ;;  %s808_s23 = smov 16  }
  0x12   :  { %22 = dma.hbm_to_vmem [thread:$0]  %s872_s0, 512, %s17_s13, [#allocation3], %s807_s22, %s807_s22, %s808_s23  }
  0x13   :  { %s809_s26 = smov [#allocation5]   ;;  %s756_s30 = scalar_lea.hbm %s873_s1, 8192 }
  0x14   :  { %s28_s27 = sshll.u32 %s809_s26, 4  ;;  %p757_p8 = scmp.ne.s32.totalorder %s873_s1, %s756_s30  ;;  %s29_s27 = int_to_ptr.vmem [resolvable:$true] %s28_s27 }
  0x15   :  { %p760_p9 = scmp.lt.u32.totalorder %s756_s30, %s873_s1 }
  0x17   :  { %p762_p10 = pnand %p760_p9, %p757_p8 }
  0x19   :  { %765 = shalt.err (!%p762_p10)
}
  0x1a   :  { %s766_s8 = scalar_lea.vmem %s29_s27, 8192  ;;  %p771_p12 = scmp.lt.s32.totalorder %s29_s27, %s29_s27 }
  0x1b   :  { %p767_p11 = scmp.ne.s32.totalorder %s29_s27, %s766_s8  ;;  %p772_p13 = scmp.lt.s32.totalorder %s766_s8, %s766_s8 }
  0x1d   :  { %p773_p0 = por %p772_p13, %p771_p12 }
  0x1f   :  { %p774_p1 = pnand %p773_p0, %p767_p11 }
  0x21   :  { %777 = shalt.err (!%p774_p1)
}
  0x22   :  { %34 = dma.hbm_to_vmem [thread:$0]  %s873_s1, 8192, %s29_s27, [#allocation6], %s807_s22, %s807_s22, %s808_s23  }
  0x23   :  { %800 = dma.done.wait [#allocation3], 512  }
  0x24   :  { %801 = vsyncadd [#allocation3], 4294966784 }
  0x25   :  { %802 = dma.done.wait [#allocation6], 8192  }
  0x26   :  { %803 = vsyncadd [#allocation6], 4294959104  ;;  %v638_v0 = vld [vmem:[#allocation5 + $0x4] ss:$16 sps:$4 sm:$0xff]   ;;  %v640_v1 = vld [vmem:[#allocation5 + $0xc] ss:$16 sps:$4 sm:$0xff]  }
  0x27   :  { %455 = vmatprep.subr.bf16.mxu0 %v638_v0  ;;  %v642_v2 = vld [vmem:[#allocation5] ss:$16 sps:$4 sm:$0xff]   ;;  %v643_v3 = vld [vmem:[#allocation5 + $0x8] ss:$16 sps:$4 sm:$0xff]   ;;  %498 = vmatprep.subr.bf16.mxu1 %v640_v1  ;;  %v644_v4 = vld [vmem:[#allocation5 + $0x24] ss:$16 sps:$4 sm:$0xff]  }
  0x28   :  { %456 = vmatpush1.bf16.msra.mxu0 %v642_v2  ;;  %499 = vmatpush1.bf16.msra.mxu1 %v643_v3  ;;  %v646_v5 = vld [vmem:[#allocation5 + $0x2c] ss:$16 sps:$4 sm:$0xff]   ;;  %v648_v6 = vld [vmem:[#allocation5 + $0x20] ss:$16 sps:$4 sm:$0xff]   ;;  %v649_v7 = vld [vmem:[#allocation5 + $0x28] ss:$16 sps:$4 sm:$0xff]  }
  0x29   :  { %457 = vmatprep.subr.bf16.mxu0 %v644_v4  ;;  %500 = vmatprep.subr.bf16.mxu1 %v646_v5  ;;  %v650_v8 = vld [vmem:[#allocation5 + $0x44] ss:$16 sps:$4 sm:$0xff]   ;;  %v652_v9 = vld [vmem:[#allocation5 + $0x4c] ss:$16 sps:$4 sm:$0xff]   ;;  %v654_v10 = vld [vmem:[#allocation5 + $0x40] ss:$16 sps:$4 sm:$0xff]  }
  0x2a   :  { %v655_v11 = vld [vmem:[#allocation5 + $0x48] ss:$16 sps:$4 sm:$0xff]   ;;  %v656_v12 = vld [vmem:[#allocation5 + $0x64] ss:$16 sps:$4 sm:$0xff]   ;;  %v658_v13 = vld [vmem:[#allocation5 + $0x6c] ss:$16 sps:$4 sm:$0xff]  }
  0x2b   :  { %v660_v14 = vld [vmem:[#allocation5 + $0x60] ss:$16 sps:$4 sm:$0xff]   ;;  %v661_v15 = vld [vmem:[#allocation5 + $0x68] ss:$16 sps:$4 sm:$0xff]   ;;  %v662_v16 = vld [vmem:[#allocation5 + $0x84] ss:$16 sps:$4 sm:$0xff]  }
  0x2c   :  { %458 = vmatpush1.bf16.msra.mxu0 %v648_v6  ;;  %501 = vmatpush1.bf16.msra.mxu1 %v649_v7  ;;  %v664_v17 = vld [vmem:[#allocation5 + $0x8c] ss:$16 sps:$4 sm:$0xff]   ;;  %v666_v18 = vld [vmem:[#allocation5 + $0x80] ss:$16 sps:$4 sm:$0xff]   ;;  %v667_v19 = vld [vmem:[#allocation5 + $0x88] ss:$16 sps:$4 sm:$0xff]   ;;  %v115_v6 = vlaneseq }
  0x2d   :  { %459 = vmatprep.subr.bf16.mxu0 %v650_v8  ;;  %502 = vmatprep.subr.bf16.mxu1 %v652_v9  ;;  %v668_v20 = vld [vmem:[#allocation5 + $0xa4] ss:$16 sps:$4 sm:$0xff]   ;;  %v670_v21 = vld [vmem:[#allocation5 + $0xac] ss:$16 sps:$4 sm:$0xff]   ;;  %v672_v22 = vld [vmem:[#allocation5 + $0xa0] ss:$16 sps:$4 sm:$0xff]  }
  0x2e   :  { %v673_v23 = vld [vmem:[#allocation5 + $0xa8] ss:$16 sps:$4 sm:$0xff]   ;;  %v674_v24 = vld [vmem:[#allocation5 + $0xc4] ss:$16 sps:$4 sm:$0xff]   ;;  %v676_v25 = vld [vmem:[#allocation5 + $0xcc] ss:$16 sps:$4 sm:$0xff]  }
  0x2f   :  { %v678_v26 = vld [vmem:[#allocation5 + $0xc0] ss:$16 sps:$4 sm:$0xff]   ;;  %v679_v27 = vld [vmem:[#allocation5 + $0xc8] ss:$16 sps:$4 sm:$0xff]   ;;  %v680_v28 = vld [vmem:[#allocation5 + $0xe4] ss:$16 sps:$4 sm:$0xff]  }
  0x30   :  { %460 = vmatpush1.bf16.msra.mxu0 %v654_v10  ;;  %503 = vmatpush1.bf16.msra.mxu1 %v655_v11  ;;  %v682_v29 = vld [vmem:[#allocation5 + $0xec] ss:$16 sps:$4 sm:$0xff]   ;;  %v684_v30 = vld [vmem:[#allocation5 + $0xe0] ss:$16 sps:$4 sm:$0xff]   ;;  %v685_v31 = vld [vmem:[#allocation5 + $0xe8] ss:$16 sps:$4 sm:$0xff]  }
  0x31   :  { %461 = vmatprep.subr.bf16.mxu0 %v656_v12  ;;  %504 = vmatprep.subr.bf16.mxu1 %v658_v13  ;;  %v686_v32 = vld [vmem:[#allocation5 + $0x104] ss:$16 sps:$4 sm:$0xff]   ;;  %v688_v33 = vld [vmem:[#allocation5 + $0x10c] ss:$16 sps:$4 sm:$0xff]   ;;  %v690_v34 = vld [vmem:[#allocation5 + $0x100] ss:$16 sps:$4 sm:$0xff]  }
  0x32   :  { %v691_v35 = vld [vmem:[#allocation5 + $0x108] ss:$16 sps:$4 sm:$0xff]   ;;  %v692_v36 = vld [vmem:[#allocation5 + $0x124] ss:$16 sps:$4 sm:$0xff]   ;;  %v694_v37 = vld [vmem:[#allocation5 + $0x12c] ss:$16 sps:$4 sm:$0xff]  }
  0x33   :  { %v696_v38 = vld [vmem:[#allocation5 + $0x120] ss:$16 sps:$4 sm:$0xff]   ;;  %v697_v39 = vld [vmem:[#allocation5 + $0x128] ss:$16 sps:$4 sm:$0xff]   ;;  %v698_v40 = vld [vmem:[#allocation5 + $0x144] ss:$16 sps:$4 sm:$0xff]  }
  0x34   :  { %462 = vmatpush1.bf16.msra.mxu0 %v660_v14  ;;  %505 = vmatpush1.bf16.msra.mxu1 %v661_v15  ;;  %v700_v41 = vld [vmem:[#allocation5 + $0x14c] ss:$16 sps:$4 sm:$0xff]   ;;  %v702_v42 = vld [vmem:[#allocation5 + $0x140] ss:$16 sps:$4 sm:$0xff]   ;;  %v703_v43 = vld [vmem:[#allocation5 + $0x148] ss:$16 sps:$4 sm:$0xff]  }
  0x35   :  { %463 = vmatprep.subr.bf16.mxu0 %v662_v16  ;;  %506 = vmatprep.subr.bf16.mxu1 %v664_v17  ;;  %v704_v44 = vld [vmem:[#allocation5 + $0x164] ss:$16 sps:$4 sm:$0xff]   ;;  %v706_v45 = vld [vmem:[#allocation5 + $0x16c] ss:$16 sps:$4 sm:$0xff]   ;;  %v708_v48 = vld [vmem:[#allocation5 + $0x160] ss:$16 sps:$4 sm:$0xff]  }
  0x36   :  { %v44_v46 = vld [vmem:[#allocation2 + $0x8] sm:$0xff]  ;;  %v46_v47 = vld [vmem:[#allocation2 + $0x18] sm:$0xff]  ;;  %v710_v51 = vld [vmem:[#allocation5 + $0x184] ss:$16 sps:$4 sm:$0xff]   ;;  %v116_v7 = vshrl.u32 %v115_v6, 7  ;;  %s810_s11 = smov [#allocation7]  }
  0x37   :  { %v709_v49 = vld [vmem:[#allocation5 + $0x168] ss:$16 sps:$4 sm:$0xff]   ;;  %v48_v50 = vpack.c.bf16 %v46_v47, %v44_v46  ;;  %v712_v52 = vld [vmem:[#allocation5 + $0x18c] ss:$16 sps:$4 sm:$0xff]   ;;  %v714_v53 = vld [vmem:[#allocation5 + $0x180] ss:$16 sps:$4 sm:$0xff]  }
  0x38   :  { %464 = vmatpush1.bf16.msra.mxu0 %v666_v18  ;;  %507 = vmatpush1.bf16.msra.mxu1 %v667_v19  ;;  %v715_v54 = vld [vmem:[#allocation5 + $0x188] ss:$16 sps:$4 sm:$0xff]   ;;  %v716_v55 = vld [vmem:[#allocation5 + $0x1a4] ss:$16 sps:$4 sm:$0xff]   ;;  %v718_v56 = vld [vmem:[#allocation5 + $0x1ac] ss:$16 sps:$4 sm:$0xff]  }
  0x39   :  { %465 = vmatprep.subr.bf16.mxu0 %v668_v20  ;;  %508 = vmatprep.subr.bf16.mxu1 %v670_v21  ;;  %v720_v57 = vld [vmem:[#allocation5 + $0x1a0] ss:$16 sps:$4 sm:$0xff]   ;;  %v721_v58 = vld [vmem:[#allocation5 + $0x1a8] ss:$16 sps:$4 sm:$0xff]   ;;  %v722_v59 = vld [vmem:[#allocation5 + $0x1c4] ss:$16 sps:$4 sm:$0xff]  }
  0x3a   :  { %487 = vmatprep.mubr.bf16.mxu0 %v48_v50  ;;  %530 = vmatprep.mubr.bf16.mxu1 %v48_v50  ;;  %v724_v60 = vld [vmem:[#allocation5 + $0x1cc] ss:$16 sps:$4 sm:$0xff]   ;;  %v726_v61 = vld [vmem:[#allocation5 + $0x1c0] ss:$16 sps:$4 sm:$0xff]   ;;  %v727_v62 = vld [vmem:[#allocation5 + $0x1c8] ss:$16 sps:$4 sm:$0xff]  }
  0x3b   :  { %v728_v63 = vld [vmem:[#allocation5 + $0x1e4] ss:$16 sps:$4 sm:$0xff]   ;;  %v730_v0 = vld [vmem:[#allocation5 + $0x1ec] ss:$16 sps:$4 sm:$0xff]   ;;  %v732_v1 = vld [vmem:[#allocation5 + $0x1e0] ss:$16 sps:$4 sm:$0xff]  }
  0x3c   :  { %466 = vmatpush1.bf16.msra.mxu0 %v672_v22  ;;  %509 = vmatpush1.bf16.msra.mxu1 %v673_v23  ;;  %v733_v2 = vld [vmem:[#allocation5 + $0x1e8] ss:$16 sps:$4 sm:$0xff]   ;;  %v43_v3 = vld [vmem:[#allocation2] sm:$0xff]  ;;  %v45_v4 = vld [vmem:[#allocation2 + $0x10] sm:$0xff]  ;;  %v117_v8 = vsub.s32 0, %v116_v7  ;;  %v125_v9 = vsub.s32 2, %v116_v7 }
  0x3d   :  { %467 = vmatprep.subr.bf16.mxu0 %v674_v24  ;;  %510 = vmatprep.subr.bf16.mxu1 %v676_v25  ;;  %v47_v5 = vpack.c.bf16 %v45_v4, %v43_v3  ;;  %v113_v10 = vld [vmem:[%s874_s2] sm:$0xf]  ;;  %v121_v11 = vsub.s32 1, %v116_v7  ;;  %v129_v12 = vsub.s32 3, %v116_v7  ;;  %s554_s12 = sshll.u32 %s810_s11, 4  ;;  %s555_s12 = int_to_ptr.vmem [resolvable:$true] %s554_s12 }
  0x3e   :  { %v118_v13 = vrot.slane %v113_v10, %v117_v8  ;;  %v126_v14 = vrot.slane %v113_v10, %v125_v9  ;;  %s778_s2 = scalar_lea.vmem %s555_s12, 1024  ;;  %p783_p3 = scmp.lt.s32.totalorder %s555_s12, %s555_s12 }
  0x3f   :  { %v122_v15 = vrot.slane %v113_v10, %v121_v11  ;;  %v130_v16 = vrot.slane %v113_v10, %v129_v12  ;;  %p779_p2 = scmp.ne.s32.totalorder %s555_s12, %s778_s2  ;;  %p784_p4 = scmp.lt.s32.totalorder %s778_s2, %s778_s2 }
  0x40   :  { %468 = vmatpush1.bf16.msra.mxu0 %v678_v26  ;;  %511 = vmatpush1.bf16.msra.mxu1 %v679_v27 }
  0x41   :  { %469 = vmatprep.subr.bf16.mxu0 %v680_v28  ;;  %512 = vmatprep.subr.bf16.mxu1 %v682_v29  ;;  %p785_p5 = por %p784_p4, %p783_p3 }
  0x43   :  { %p786_p6 = pnand %p785_p5, %p779_p2 }
  0x44   :  { %470 = vmatpush1.bf16.msra.mxu0 %v684_v30  ;;  %513 = vmatpush1.bf16.msra.mxu1 %v685_v31 }
  0x45   :  { %471 = vmatprep.subr.bf16.mxu0 %v686_v32  ;;  %514 = vmatprep.subr.bf16.mxu1 %v688_v33 }
  0x48   :  { %472 = vmatpush1.bf16.msra.mxu0 %v690_v34  ;;  %515 = vmatpush1.bf16.msra.mxu1 %v691_v35 }
  0x49   :  { %473 = vmatprep.subr.bf16.mxu0 %v692_v36  ;;  %516 = vmatprep.subr.bf16.mxu1 %v694_v37 }
  0x4c   :  { %474 = vmatpush1.bf16.msra.mxu0 %v696_v38  ;;  %517 = vmatpush1.bf16.msra.mxu1 %v697_v39 }
  0x4d   :  { %475 = vmatprep.subr.bf16.mxu0 %v698_v40  ;;  %518 = vmatprep.subr.bf16.mxu1 %v700_v41 }
  0x50   :  { %476 = vmatpush1.bf16.msra.mxu0 %v702_v42  ;;  %519 = vmatpush1.bf16.msra.mxu1 %v703_v43 }
  0x51   :  { %477 = vmatprep.subr.bf16.mxu0 %v704_v44  ;;  %520 = vmatprep.subr.bf16.mxu1 %v706_v45 }
  0x54   :  { %478 = vmatpush1.bf16.msra.mxu0 %v708_v48  ;;  %521 = vmatpush1.bf16.msra.mxu1 %v709_v49 }
  0x55   :  { %479 = vmatprep.subr.bf16.mxu0 %v710_v51  ;;  %522 = vmatprep.subr.bf16.mxu1 %v712_v52 }
  0x58   :  { %480 = vmatpush1.bf16.msra.mxu0 %v714_v53  ;;  %523 = vmatpush1.bf16.msra.mxu1 %v715_v54 }
  0x59   :  { %481 = vmatprep.subr.bf16.mxu0 %v716_v55  ;;  %524 = vmatprep.subr.bf16.mxu1 %v718_v56 }
  0x5c   :  { %482 = vmatpush1.bf16.msra.mxu0 %v720_v57  ;;  %525 = vmatpush1.bf16.msra.mxu1 %v721_v58 }
  0x5d   :  { %483 = vmatprep.subr.bf16.mxu0 %v722_v59  ;;  %526 = vmatprep.subr.bf16.mxu1 %v724_v60 }
  0x60   :  { %484 = vmatpush1.bf16.msra.mxu0 %v726_v61  ;;  %527 = vmatpush1.bf16.msra.mxu1 %v727_v62 }
  0x61   :  { %485 = vmatprep.subr.bf16.mxu0 %v728_v63  ;;  %528 = vmatprep.subr.bf16.mxu1 %v730_v0 }
  0x64   :  { %486 = vmatpush1.bf16.msra.mxu0 %v732_v1  ;;  %529 = vmatpush1.bf16.msra.mxu1 %v733_v2 }
  0x67   :  { %488 = vmatmul.mubr.bf16.vlgmr.msra.gmra.mrb[0].mxu0 %v47_v5  ;;  %531 = vmatmul.mubr.bf16.vlgmr.msra.gmra.mrb[0].mxu1 %v47_v5 }
 0x13a   :  { %v489_v17 = vpop.f32.mrb[0].mxu0  ;;  %v532_v18 = vpop.f32.mrb[0].mxu1 }
 0x13b   :  { %v490_v19 = vadd.f32 %v489_v17, %v118_v13  ;;  %v533_v20 = vadd.f32 %v532_v18, %v126_v14  ;;  %v491_v21 = vpop.f32.mrb[1].mxu0  ;;  %v534_v22 = vpop.f32.mrb[1].mxu1 }
 0x13c   :  { %v492_v23 = vadd.f32 %v491_v21, %v122_v15  ;;  %v535_v24 = vadd.f32 %v534_v22, %v130_v16  ;;  %v493_v25 = vpop.f32.mrb[2].mxu0  ;;  %v536_v26 = vpop.f32.mrb[2].mxu1 }
 0x13d   :  { %541 = vst [vmem:[#allocation7] sm:$0xff] %v490_v19  ;;  %543 = vst [vmem:[#allocation7 + $0x10] sm:$0xff] %v533_v20  ;;  %v494_v27 = vadd.f32 %v493_v25, %v118_v13  ;;  %v537_v28 = vadd.f32 %v536_v26, %v126_v14  ;;  %v495_v29 = vpop.f32.mrb[3].mxu0  ;;  %v538_v30 = vpop.f32.mrb[3].mxu1 }
 0x13e   :  { %542 = vst [vmem:[#allocation7 + $0x8] sm:$0xff] %v492_v23  ;;  %544 = vst [vmem:[#allocation7 + $0x18] sm:$0xff] %v535_v24  ;;  %v496_v31 = vadd.f32 %v495_v29, %v122_v15  ;;  %v539_v32 = vadd.f32 %v538_v30, %v130_v16 }
 0x13f   :  { %545 = vst [vmem:[#allocation7 + $0x20] sm:$0xff] %v494_v27  ;;  %547 = vst [vmem:[#allocation7 + $0x30] sm:$0xff] %v537_v28 }
 0x140   :  { %546 = vst [vmem:[#allocation7 + $0x28] sm:$0xff] %v496_v31  ;;  %548 = vst [vmem:[#allocation7 + $0x38] sm:$0xff] %v539_v32 }
 0x141   :  { %789 = shalt.err (!%p786_p6)
}
 0x142   :  { %s790_s15 = scalar_lea.hbm %s875_s3, 1024 }
 0x143   :  { %p791_p7 = scmp.ne.s32.totalorder %s875_s3, %s790_s15  ;;  %p794_p8 = scmp.lt.u32.totalorder %s790_s15, %s875_s3 }
 0x145   :  { %p796_p9 = pnand %p794_p8, %p791_p7 }
 0x147   :  { %799 = shalt.err (!%p796_p9)
}
 0x148   :  { %s811_s20 = smov 512   ;;  %s812_s21 = smov 32  }
 0x149   :  { %560 = dma.vmem_to_hbm [thread:$0]  %s555_s12, 1024, %s875_s3, [#allocation4], %s811_s20, %s811_s20, %s812_s21  }
 0x14a   :  { %804 = dma.done.wait [#allocation4], 1024  }
 0x14b   :  { %805 = vsyncadd [#allocation4], 4294966272 }
 0x14c   :  { %564 = vsyncpa [#allocation3], 1 }
 0x14d   :  { %565 = vsyncpa [#allocation6], 1 }
 0x14e   :  { %566 = vsyncpa [#allocation4], 1 }

</bundles_post_ra>
